<compile_context>
chip_gen: v7x
topology: tpu7x:2x2x1
jax: 0.10.0
libtpu: 0.0.40
codegen_flags: <defaults>
</compile_context>

<pallas_src>
import math

import jax
import jax.numpy as jnp
from jax import lax
from jax.experimental import pallas as pl
from jax.experimental.pallas import tpu as pltpu


# ---------------------------------------------------------------------------
# Parameter prep (done once, outside the per-call path).
# ---------------------------------------------------------------------------
def prepare_qkv_weight(w_qkv, *, compute_dtype=jnp.bfloat16):
    """Convert the PyTorch-layout (3*D, D) `to_qvk` weight into one fused
    (D, 3*D) matmul operand  [ wq*scale | wk | wv ].

    PyTorch computes qkv = x @ w_qkv.T and then rearranges 'b t (d k)' with
    k=3, i.e. q/k/v are the interleaved output columns 0::3 / 1::3 / 2::3.
    The 1/sqrt(D) score scale is folded into the q projection (scales T*D
    elements once instead of the T*T score matrix).
    """
    three_d, D = w_qkv.shape
    assert three_d == 3 * D, w_qkv.shape
    scale = D ** (-0.5)
    wq = jnp.transpose(w_qkv[0::3, :]) * scale    # (D, D), scale pre-folded
    wk = jnp.transpose(w_qkv[1::3, :])            # (D, D)
    wv = jnp.transpose(w_qkv[2::3, :])            # (D, D)
    return jnp.concatenate([wq, wk, wv], axis=1).astype(compute_dtype)


# ---------------------------------------------------------------------------
# Kernel 1: fused QKV projection  (rows, D) @ (D, 3D)  ->  q, k, v (bf16)
# ---------------------------------------------------------------------------
def _qkv_projection_kernel(x_ref, w_ref, q_ref, k_ref, v_ref):
    D = q_ref.shape[-1]
    x = x_ref[...].astype(w_ref.dtype)             # bf16 MXU operand
    # Single wide matmul, one bf16 MXU pass, f32 accumulation.
    qkv = jnp.dot(x, w_ref[...], preferred_element_type=jnp.float32)
    q_ref[...] = qkv[:, 0 * D:1 * D].astype(q_ref.dtype)
    k_ref[...] = qkv[:, 1 * D:2 * D].astype(k_ref.dtype)
    v_ref[...] = qkv[:, 2 * D:3 * D].astype(v_ref.dtype)


# ---------------------------------------------------------------------------
# Kernel 2: flash attention (online softmax, deferred normalization).
# Grid = (batch, query tile, key tile); key axis is the accumulation axis.
# ---------------------------------------------------------------------------
def _flash_attention_kernel(q_ref, k_ref, v_ref, o_ref, m_scr, l_scr, acc_scr):
    ki = pl.program_id(2)

    @pl.when(ki == 0)
    def _init():
        m_scr[...] = jnp.full_like(m_scr, -jnp.inf)
        l_scr[...] = jnp.zeros_like(l_scr)
        acc_scr[...] = jnp.zeros_like(acc_scr)

    q = q_ref[0]                                   # (tq, D), scale pre-folded
    k = k_ref[0]                                   # (tk, D)
    v = v_ref[0]                                   # (tk, D)

    # Scores on the MXU: bf16 operands, single pass, f32 accumulation.
    s = jnp.dot(q, k.T, preferred_element_type=jnp.float32)      # (tq, tk)

    m_prev = m_scr[...]
    m_new = jnp.maximum(m_prev, jnp.max(s, axis=-1, keepdims=True))
    alpha = jnp.exp(m_prev - m_new)
    p = jnp.exp(s - m_new)

    l_scr[...] = alpha * l_scr[...] + jnp.sum(p, axis=-1, keepdims=True)
    acc_scr[...] = alpha * acc_scr[...] + jnp.dot(
        p.astype(v.dtype), v, preferred_element_type=jnp.float32)
    m_scr[...] = m_new

    @pl.when(ki == pl.num_programs(2) - 1)
    def _finalize():
        # Deferred normalization: one EUP reciprocal over (tq, 1) and a
        # (tq, D) scale instead of dividing the (tq, tk) probability matrix.
        inv_l = pl.reciprocal(l_scr[...], approx=True)
        o_ref[0] = (acc_scr[...] * inv_l).astype(o_ref.dtype)


# ---------------------------------------------------------------------------
# Tiling / VMEM budget helpers.
# ---------------------------------------------------------------------------
def _pick_tile(total, desired):
    """Largest tile <= desired that divides `total` and is a multiple of 8
    (sublane aligned); falls back to the full axis, which is always legal."""
    if total <= desired:
        return total
    best = None
    for t in range(8, desired + 1, 8):
        if total % t == 0:
            best = t
    return best if best is not None else total


def _vmem_limit(nbytes):
    """Explicit scoped-VMEM budget: >= 32 MiB (v5e default is only 16 MiB),
    ~2x the estimated working set for pipeline headroom, capped sanely."""
    return int(min(max(2 * nbytes, 32 << 20), 96 << 20))


# ---------------------------------------------------------------------------
# Forward wrapper.
# ---------------------------------------------------------------------------
def self_attention_pallas(x, w_fused, *, q_tile=256, k_tile=256, row_tile=512):
    """Self-attention forward. x: (B, T, D); w_fused: prepare_qkv_weight(...)."""
    # TODO(synk): the optional boolean attention mask (masked_fill(-inf)) of the
    # PyTorch module is not implemented; only the mask=None path is supported.
    B, T, D = x.shape
    assert w_fused.shape == (D, 3 * D), w_fused.shape
    cdtype = w_fused.dtype
    cb = jnp.dtype(cdtype).itemsize
    xb = jnp.dtype(x.dtype).itemsize

    # ---- kernel 1: fused QKV projection over row tiles of (B*T, D) ----
    x2 = x.reshape(B * T, D)
    rm = _pick_tile(B * T, row_tile)
    proj_need = (2 * (rm * D * xb + 3 * rm * D * cb)     # pipelined x + q/k/v
                 + 2 * (D * 3 * D * cb)                  # grid-invariant weight (x2 buffers)
                 + rm * 3 * D * 4)                       # f32 matmul result
    # NOTE: the weight block is grid-invariant; pipeline_mode=pl.Buffered(1)
    # would trim its second buffer on very large D (left at the default here).
    q2, k2, v2 = pl.pallas_call(
        _qkv_projection_kernel,
        out_shape=[jax.ShapeDtypeStruct((B * T, D), cdtype)] * 3,
        grid_spec=pltpu.PrefetchScalarGridSpec(
            num_scalar_prefetch=0,
            grid=(B * T // rm,),
            in_specs=[
                pl.BlockSpec((rm, D), lambda i: (i, 0)),       # x rows
                pl.BlockSpec((D, 3 * D), lambda i: (0, 0)),    # fused weight
            ],
            out_specs=[pl.BlockSpec((rm, D), lambda i: (i, 0))] * 3,
        ),
        compiler_params=pltpu.CompilerParams(
            dimension_semantics=("parallel",),
            vmem_limit_bytes=_vmem_limit(proj_need)),
    )(x2, w_fused)
    q = q2.reshape(B, T, D)
    k = k2.reshape(B, T, D)
    v = v2.reshape(B, T, D)

    # ---- kernel 2: flash attention over (batch, query tile, key tile) ----
    tq = _pick_tile(T, q_tile)
    tk = _pick_tile(T, k_tile)
    flash_need = (2 * (tq * D * cb + 2 * tk * D * cb + tq * D * xb)  # q,k,v,out blocks
                  + tq * D * 4 + 2 * tq * 128 * 4                    # acc + m/l scratch
                  + 4 * tq * max(tk, 128) * 4)                       # s/p working set
    out = pl.pallas_call(
        _flash_attention_kernel,
        out_shape=jax.ShapeDtypeStruct((B, T, D), x.dtype),
        grid_spec=pltpu.PrefetchScalarGridSpec(
            num_scalar_prefetch=0,
            grid=(B, T // tq, T // tk),
            in_specs=[
                pl.BlockSpec((1, tq, D), lambda b, qi, ki: (b, qi, 0)),  # q
                pl.BlockSpec((1, tk, D), lambda b, qi, ki: (b, ki, 0)),  # k
                pl.BlockSpec((1, tk, D), lambda b, qi, ki: (b, ki, 0)),  # v
            ],
            out_specs=pl.BlockSpec((1, tq, D), lambda b, qi, ki: (b, qi, 0)),
            scratch_shapes=[
                pltpu.VMEM((tq, 1), jnp.float32),    # running max m
                pltpu.VMEM((tq, 1), jnp.float32),    # running denom l
                pltpu.VMEM((tq, D), jnp.float32),    # output accumulator
            ],
        ),
        compiler_params=pltpu.CompilerParams(
            dimension_semantics=("parallel", "parallel", "arbitrary"),
            vmem_limit_bytes=_vmem_limit(flash_need)),
    )(q, k, v)
    return out


# ---------------------------------------------------------------------------
# Plain-JAX reference matching the PyTorch module exactly (f32, full precision).
# ---------------------------------------------------------------------------
def self_attention_reference(x, w_qkv, mask=None):
    B, T, D = x.shape
    HIGH = lax.Precision.HIGHEST
    qkv = jnp.einsum('btd,ed->bte', x, w_qkv, precision=HIGH)     # x @ W^T
    qkv = qkv.reshape(B, T, D, 3)                                 # '(d k)', k=3
    q, k, v = qkv[..., 0], qkv[..., 1], qkv[..., 2]
    s = jnp.einsum('bid,bjd->bij', q, k, precision=HIGH) * (D ** (-0.5))
    if mask is not None:
        s = jnp.where(mask, -jnp.inf, s)
    a = jax.nn.softmax(s, axis=-1)
    return jnp.einsum('bij,bjd->bid', a, v, precision=HIGH)


if __name__ == "__main__":
    B, T, D = 2, 8, 32

    key = jax.random.PRNGKey(0)
    kx, kw = jax.random.split(key)
    x = jax.random.normal(kx, (B, T, D), jnp.float32)
    # PyTorch nn.Linear default init: U(-1/sqrt(fan_in), 1/sqrt(fan_in)).
    bound = 1.0 / math.sqrt(D)
    w_qkv = jax.random.uniform(kw, (3 * D, D), jnp.float32, -bound, bound)

    w_fused = prepare_qkv_weight(w_qkv)           # once, at parameter-prep time
    attn = jax.jit(self_attention_pallas)
    out = jax.block_until_ready(attn(x, w_fused))

    ref = self_attention_reference(x, w_qkv)
    assert out.shape == (B, T, D), out.shape
    err = jnp.max(jnp.abs(out - ref))
    # bf16 operands + single-pass MXU (f32 accumulation): tolerance re-baselined
    # vs. the old f32/HIGHEST kernel.
    assert jnp.allclose(out, ref, rtol=2e-2, atol=2e-2), f"max abs err {err}"

    print("KERNEL_OK")
</pallas_src>

<mosaic_0001>
module attributes {stable_mosaic.version = 11 : i64} {
  func.func @_qkv_projection_kernel(%arg0: i32, %arg1: memref<16x32xf32, #tpu.memory_space<vmem>>, %arg2: memref<32x96xbf16, #tpu.memory_space<vmem>>, %arg3: memref<16x32xbf16, #tpu.memory_space<vmem>>, %arg4: memref<16x32xbf16, #tpu.memory_space<vmem>>, %arg5: memref<16x32xbf16, #tpu.memory_space<vmem>>) attributes {dimension_semantics = [#tpu.dimension_semantics<parallel>], iteration_bounds = array<i64: 1>, scalar_prefetch = 0 : i64, scratch_operands = 0 : i64, tpu.core_type = #tpu.core_type<tc>, window_params = [{transform_indices = @transform_0, window_bounds = array<i64: 16, 32>}, {pipeline_mode = #tpu.pipeline_mode<synchronous>, transform_indices = @transform_1, window_bounds = array<i64: 32, 96>}, {transform_indices = @transform_2, window_bounds = array<i64: 16, 32>}, {transform_indices = @transform_3, window_bounds = array<i64: 16, 32>}, {transform_indices = @transform_4, window_bounds = array<i64: 16, 32>}]} {
    %c0 = arith.constant 0 : index
    %c0_0 = arith.constant 0 : index
    %0 = vector.load %arg1[%c0, %c0_0] : memref<16x32xf32, #tpu.memory_space<vmem>>, vector<16x32xf32>
    %1 = arith.truncf %0 : vector<16x32xf32> to vector<16x32xbf16>
    %c0_1 = arith.constant 0 : index
    %c0_2 = arith.constant 0 : index
    %2 = vector.load %arg2[%c0_1, %c0_2] : memref<32x96xbf16, #tpu.memory_space<vmem>>, vector<32x96xbf16>
    %cst = arith.constant dense<0.000000e+00> : vector<16x96xf32>
    %3 = tpu.matmul %1, %2, %cst {dimension_numbers = #tpu.dot_dimension_numbers<[1], [0], [0], [1], [0, 0, 1, 1], [], []>} : vector<16x32xbf16>, vector<32x96xbf16>, vector<16x96xf32> -> vector<16x96xf32>
    %4 = vector.extract_strided_slice %3 {offsets = [0, 0], sizes = [16, 32], strides = [1, 1]} : vector<16x96xf32> to vector<16x32xf32>
    %5 = arith.truncf %4 : vector<16x32xf32> to vector<16x32xbf16>
    %c0_3 = arith.constant 0 : index
    %c0_4 = arith.constant 0 : index
    %6 = vector.load %arg3[%c0_3, %c0_4] : memref<16x32xbf16, #tpu.memory_space<vmem>>, vector<16x32xbf16>
    tpu.vector_store %arg3[%c0_3, %c0_4], %5 {strides = array<i32>} : memref<16x32xbf16, #tpu.memory_space<vmem>>, vector<16x32xbf16>,
    %7 = vector.extract_strided_slice %3 {offsets = [0, 32], sizes = [16, 32], strides = [1, 1]} : vector<16x96xf32> to vector<16x32xf32>
    %8 = arith.truncf %7 : vector<16x32xf32> to vector<16x32xbf16>
    %c0_5 = arith.constant 0 : index
    %c0_6 = arith.constant 0 : index
    %9 = vector.load %arg4[%c0_5, %c0_6] : memref<16x32xbf16, #tpu.memory_space<vmem>>, vector<16x32xbf16>
    tpu.vector_store %arg4[%c0_5, %c0_6], %8 {strides = array<i32>} : memref<16x32xbf16, #tpu.memory_space<vmem>>, vector<16x32xbf16>,
    %10 = vector.extract_strided_slice %3 {offsets = [0, 64], sizes = [16, 32], strides = [1, 1]} : vector<16x96xf32> to vector<16x32xf32>
    %11 = arith.truncf %10 : vector<16x32xf32> to vector<16x32xbf16>
    %c0_7 = arith.constant 0 : index
    %c0_8 = arith.constant 0 : index
    %12 = vector.load %arg5[%c0_7, %c0_8] : memref<16x32xbf16, #tpu.memory_space<vmem>>, vector<16x32xbf16>
    tpu.vector_store %arg5[%c0_7, %c0_8], %11 {strides = array<i32>} : memref<16x32xbf16, #tpu.memory_space<vmem>>, vector<16x32xbf16>,
    return
  }
  func.func @transform_0(%arg0: i32) -> (i32, i32) {
    %c0_i32 = arith.constant 0 : i32
    %c0_i32_0 = arith.constant 0 : i32
    return %arg0, %c0_i32 : i32, i32
  }
  func.func @transform_1(%arg0: i32) -> (i32, i32) {
    %c0_i32 = arith.constant 0 : i32
    %c0_i32_0 = arith.constant 0 : i32
    %c0_i32_1 = arith.constant 0 : i32
    return %c0_i32, %c0_i32_0 : i32, i32
  }
  func.func @transform_2(%arg0: i32) -> (i32, i32) {
    %c0_i32 = arith.constant 0 : i32
    %c0_i32_0 = arith.constant 0 : i32
    return %arg0, %c0_i32 : i32, i32
  }
  func.func @transform_3(%arg0: i32) -> (i32, i32) {
    %c0_i32 = arith.constant 0 : i32
    %c0_i32_0 = arith.constant 0 : i32
    return %arg0, %c0_i32 : i32, i32
  }
  func.func @transform_4(%arg0: i32) -> (i32, i32) {
    %c0_i32 = arith.constant 0 : i32
    %c0_i32_0 = arith.constant 0 : i32
    return %arg0, %c0_i32 : i32, i32
  }
}

module attributes {stable_mosaic.version = 11 : i64} {
  func.func @_flash_attention_kernel(%arg0: i32, %arg1: i32, %arg2: i32, %arg3: memref<1x8x32xbf16, #tpu.memory_space<vmem>>, %arg4: memref<1x8x32xbf16, #tpu.memory_space<vmem>>, %arg5: memref<1x8x32xbf16, #tpu.memory_space<vmem>>, %arg6: memref<1x8x32xf32, #tpu.memory_space<vmem>>, %arg7: memref<8x1xf32, #tpu.memory_space<vmem>>, %arg8: memref<8x1xf32, #tpu.memory_space<vmem>>, %arg9: memref<8x32xf32, #tpu.memory_space<vmem>>) attributes {dimension_semantics = [#tpu.dimension_semantics<parallel>, #tpu.dimension_semantics<parallel>, #tpu.dimension_semantics<arbitrary>], iteration_bounds = array<i64: 2, 1, 1>, scalar_prefetch = 0 : i64, scratch_operands = 3 : i64, tpu.core_type = #tpu.core_type<tc>, window_params = [{transform_indices = @transform_0, window_bounds = array<i64: 1, 8, 32>}, {transform_indices = @transform_1, window_bounds = array<i64: 1, 8, 32>}, {transform_indices = @transform_2, window_bounds = array<i64: 1, 8, 32>}, {transform_indices = @transform_3, window_bounds = array<i64: 1, 8, 32>}]} {
    %c0_i32 = arith.constant 0 : i32
    %0 = arith.cmpi eq, %arg2, %c0_i32 : i32
    %1 = arith.extui %0 : i1 to i32
    %c0_i32_0 = arith.constant 0 : i32
    %2 = arith.cmpi ne, %1, %c0_i32_0 : i32
    scf.if %2 {
      %cst_26 = arith.constant 0xFF800000 : f32
      %37 = vector.broadcast %cst_26 : f32 to vector<8x1xf32>
      %c0_27 = arith.constant 0 : index
      %c0_28 = arith.constant 0 : index
      %38 = vector.load %arg7[%c0_27, %c0_28] : memref<8x1xf32, #tpu.memory_space<vmem>>, vector<8x1xf32>
      tpu.vector_store %arg7[%c0_27, %c0_28], %37 {strides = array<i32>} : memref<8x1xf32, #tpu.memory_space<vmem>>, vector<8x1xf32>,
      %cst_29 = arith.constant 0.000000e+00 : f32
      %39 = vector.broadcast %cst_29 : f32 to vector<8x1xf32>
      %c0_30 = arith.constant 0 : index
      %c0_31 = arith.constant 0 : index
      %40 = vector.load %arg8[%c0_30, %c0_31] : memref<8x1xf32, #tpu.memory_space<vmem>>, vector<8x1xf32>
      tpu.vector_store %arg8[%c0_30, %c0_31], %39 {strides = array<i32>} : memref<8x1xf32, #tpu.memory_space<vmem>>, vector<8x1xf32>,
      %cst_32 = arith.constant 0.000000e+00 : f32
      %41 = vector.broadcast %cst_32 : f32 to vector<8x32xf32>
      %c0_33 = arith.constant 0 : index
      %c0_34 = arith.constant 0 : index
      %42 = vector.load %arg9[%c0_33, %c0_34] : memref<8x32xf32, #tpu.memory_space<vmem>>, vector<8x32xf32>
      tpu.vector_store %arg9[%c0_33, %c0_34], %41 {strides = array<i32>} : memref<8x32xf32, #tpu.memory_space<vmem>>, vector<8x32xf32>,
    } else {
    }
    %c0 = arith.constant 0 : index
    %c0_1 = arith.constant 0 : index
    %c0_2 = arith.constant 0 : index
    %3 = vector.load %arg3[%c0, %c0_1, %c0_2] : memref<1x8x32xbf16, #tpu.memory_space<vmem>>, vector<1x8x32xbf16>
    %4 = vector.shape_cast %3 : vector<1x8x32xbf16> to vector<8x32xbf16>
    %c0_3 = arith.constant 0 : index
    %c0_4 = arith.constant 0 : index
    %c0_5 = arith.constant 0 : index
    %5 = vector.load %arg4[%c0_3, %c0_4, %c0_5] : memref<1x8x32xbf16, #tpu.memory_space<vmem>>, vector<1x8x32xbf16>
    %6 = vector.shape_cast %5 : vector<1x8x32xbf16> to vector<8x32xbf16>
    %c0_6 = arith.constant 0 : index
    %c0_7 = arith.constant 0 : index
    %c0_8 = arith.constant 0 : index
    %7 = vector.load %arg5[%c0_6, %c0_7, %c0_8] : memref<1x8x32xbf16, #tpu.memory_space<vmem>>, vector<1x8x32xbf16>
    %8 = vector.shape_cast %7 : vector<1x8x32xbf16> to vector<8x32xbf16>
    %9 = tpu.transpose %6, [1, 0] : vector<8x32xbf16> -> vector<32x8xbf16>
    %cst = arith.constant dense<0.000000e+00> : vector<8x8xf32>
    %10 = tpu.matmul %4, %9, %cst {dimension_numbers = #tpu.dot_dimension_numbers<[1], [0], [0], [1], [0, 0, 1, 1], [], []>} : vector<8x32xbf16>, vector<32x8xbf16>, vector<8x8xf32> -> vector<8x8xf32>
    %c0_9 = arith.constant 0 : index
    %c0_10 = arith.constant 0 : index
    %11 = vector.load %arg7[%c0_9, %c0_10] : memref<8x1xf32, #tpu.memory_space<vmem>>, vector<8x1xf32>
    %cst_11 = arith.constant dense<0xFF800000> : vector<8xf32>
    %12 = vector.multi_reduction <maximumf>, %10, %cst_11 [1] : vector<8x8xf32> to vector<8xf32>
    %13 = vector.shape_cast %12 : vector<8xf32> to vector<8x1xf32>
    %14 = arith.maximumf %11, %13 : vector<8x1xf32>
    %15 = arith.subf %11, %14 : vector<8x1xf32>
    %16 = math.exp %15 : vector<8x1xf32>
    %17 = vector.broadcast %14 : vector<8x1xf32> to vector<8x8xf32>
    %18 = arith.subf %10, %17 : vector<8x8xf32>
    %19 = math.exp %18 : vector<8x8xf32>
    %c0_12 = arith.constant 0 : index
    %c0_13 = arith.constant 0 : index
    %20 = vector.load %arg8[%c0_12, %c0_13] : memref<8x1xf32, #tpu.memory_space<vmem>>, vector<8x1xf32>
    %21 = arith.mulf %16, %20 : vector<8x1xf32>
    %cst_14 = arith.constant dense<0.000000e+00> : vector<8xf32>
    %22 = vector.multi_reduction <add>, %19, %cst_14 [1] : vector<8x8xf32> to vector<8xf32>
    %23 = vector.shape_cast %22 : vector<8xf32> to vector<8x1xf32>
    %24 = arith.addf %21, %23 : vector<8x1xf32>
    %c0_15 = arith.constant 0 : index
    %c0_16 = arith.constant 0 : index
    %25 = vector.load %arg8[%c0_15, %c0_16] : memref<8x1xf32, #tpu.memory_space<vmem>>, vector<8x1xf32>
    tpu.vector_store %arg8[%c0_15, %c0_16], %24 {strides = array<i32>} : memref<8x1xf32, #tpu.memory_space<vmem>>, vector<8x1xf32>,
    %c0_17 = arith.constant 0 : index
    %c0_18 = arith.constant 0 : index
    %26 = vector.load %arg9[%c0_17, %c0_18] : memref<8x32xf32, #tpu.memory_space<vmem>>, vector<8x32xf32>
    %27 = vector.broadcast %16 : vector<8x1xf32> to vector<8x32xf32>
    %28 = arith.mulf %27, %26 : vector<8x32xf32>
    %29 = arith.truncf %19 : vector<8x8xf32> to vector<8x8xbf16>
    %cst_19 = arith.constant dense<0.000000e+00> : vector<8x32xf32>
    %30 = tpu.matmul %29, %8, %cst_19 {dimension_numbers = #tpu.dot_dimension_numbers<[1], [0], [0], [1], [0, 0, 1, 1], [], []>} : vector<8x8xbf16>, vector<8x32xbf16>, vector<8x32xf32> -> vector<8x32xf32>
    %31 = arith.addf %28, %30 : vector<8x32xf32>
    %c0_20 = arith.constant 0 : index
    %c0_21 = arith.constant 0 : index
    %32 = vector.load %arg9[%c0_20, %c0_21] : memref<8x32xf32, #tpu.memory_space<vmem>>, vector<8x32xf32>
    tpu.vector_store %arg9[%c0_20, %c0_21], %31 {strides = array<i32>} : memref<8x32xf32, #tpu.memory_space<vmem>>, vector<8x32xf32>,
    %c0_22 = arith.constant 0 : index
    %c0_23 = arith.constant 0 : index
    %33 = vector.load %arg7[%c0_22, %c0_23] : memref<8x1xf32, #tpu.memory_space<vmem>>, vector<8x1xf32>
    tpu.vector_store %arg7[%c0_22, %c0_23], %14 {strides = array<i32>} : memref<8x1xf32, #tpu.memory_space<vmem>>, vector<8x1xf32>,
    %c0_i32_24 = arith.constant 0 : i32
    %34 = arith.cmpi eq, %arg2, %c0_i32_24 : i32
    %35 = arith.extui %34 : i1 to i32
    %c0_i32_25 = arith.constant 0 : i32
    %36 = arith.cmpi ne, %35, %c0_i32_25 : i32
    scf.if %36 {
      %c0_26 = arith.constant 0 : index
      %c0_27 = arith.constant 0 : index
      %37 = vector.load %arg8[%c0_26, %c0_27] : memref<8x1xf32, #tpu.memory_space<vmem>>, vector<8x1xf32>
      %38 = tpu.reciprocal %37 {approx = true} : vector<8x1xf32> -> vector<8x1xf32>
      %c0_28 = arith.constant 0 : index
      %c0_29 = arith.constant 0 : index
      %39 = vector.load %arg9[%c0_28, %c0_29] : memref<8x32xf32, #tpu.memory_space<vmem>>, vector<8x32xf32>
      %40 = vector.broadcast %38 : vector<8x1xf32> to vector<8x32xf32>
      %41 = arith.mulf %39, %40 : vector<8x32xf32>
      %c0_30 = arith.constant 0 : index
      %c0_31 = arith.constant 0 : index
      %c0_32 = arith.constant 0 : index
      %42 = vector.load %arg6[%c0_30, %c0_31, %c0_32] : memref<1x8x32xf32, #tpu.memory_space<vmem>>, vector<1x8x32xf32>
      %43 = vector.shape_cast %42 : vector<1x8x32xf32> to vector<8x32xf32>
      %44 = vector.shape_cast %41 : vector<8x32xf32> to vector<1x8x32xf32>
      tpu.vector_store %arg6[%c0_30, %c0_31, %c0_32], %44 {strides = array<i32>} : memref<1x8x32xf32, #tpu.memory_space<vmem>>, vector<1x8x32xf32>,
    } else {
    }
    return
  }
  func.func @transform_0(%arg0: i32, %arg1: i32, %arg2: i32) -> (i32, i32, i32) {
    %c0_i32 = arith.constant 0 : i32
    %c0_i32_0 = arith.constant 0 : i32
    return %arg0, %arg1, %c0_i32 : i32, i32, i32
  }
  func.func @transform_1(%arg0: i32, %arg1: i32, %arg2: i32) -> (i32, i32, i32) {
    %c0_i32 = arith.constant 0 : i32
    %c0_i32_0 = arith.constant 0 : i32
    return %arg0, %arg2, %c0_i32 : i32, i32, i32
  }
  func.func @transform_2(%arg0: i32, %arg1: i32, %arg2: i32) -> (i32, i32, i32) {
    %c0_i32 = arith.constant 0 : i32
    %c0_i32_0 = arith.constant 0 : i32
    return %arg0, %arg2, %c0_i32 : i32, i32, i32
  }
  func.func @transform_3(%arg0: i32, %arg1: i32, %arg2: i32) -> (i32, i32, i32) {
    %c0_i32 = arith.constant 0 : i32
    %c0_i32_0 = arith.constant 0 : i32
    return %arg0, %arg1, %c0_i32 : i32, i32, i32
  }
}

</mosaic_0001>

<bundles_post_ra>
// kernel: self_attention_pallas.2
= control target key start
LH: loop header
LB: loop body
LE: loop exit
PB: predicated region body
PF: predicated region fallthrough
CT: control target
= control target key end

     0   :  { %10 = vsyncpa [#allocation3], 0  ;;  %s311_s0 = inlined_call_operand.hbm [shape: f32[16,32], index: 0, kind: input, shape index: {}]   ;;  %s312_s1 = inlined_call_operand.hbm [shape: bf16[32,96], index: 1, kind: input, shape index: {}]   ;;  %s313_s2 = inlined_call_operand.vmem [shape: bf16[16,32], index: 2, kind: output, shape index: {0}]   ;;  %s314_s3 = inlined_call_operand.vmem [shape: bf16[16,32], index: 3, kind: output, shape index: {1}]   ;;  %s315_s4 = inlined_call_operand.vmem [shape: bf16[16,32], index: 4, kind: output, shape index: {2}]  }
   0x1   :  { %11 = vsyncpa [#allocation5], 0  ;;  %s225_s15 = smov [#allocation2]   ;;  %s177_s19 = scalar_lea.hbm %s311_s0, 256 }
   0x2   :  { %s17_s16 = sshll.u32 %s225_s15, 4  ;;  %p178_p0 = scmp.ne.s32.totalorder %s311_s0, %s177_s19  ;;  %s18_s16 = int_to_ptr.vmem [resolvable:$true] %s17_s16 }
   0x3   :  { %p181_p1 = scmp.lt.u32.totalorder %s177_s19, %s311_s0 }
   0x5   :  { %p183_p2 = pnand %p181_p1, %p178_p0 }
   0x7   :  { %186 = shalt.err (!%p183_p2)
}
   0x8   :  { %s187_s24 = scalar_lea.vmem %s18_s16, 256  ;;  %p192_p4 = scmp.lt.s32.totalorder %s18_s16, %s18_s16 }
   0x9   :  { %p188_p3 = scmp.ne.s32.totalorder %s18_s16, %s187_s24  ;;  %p193_p5 = scmp.lt.s32.totalorder %s187_s24, %s187_s24 }
   0xb   :  { %p194_p6 = por %p193_p5, %p192_p4 }
   0xd   :  { %p195_p7 = pnand %p194_p6, %p188_p3 }
   0xf   :  { %198 = shalt.err (!%p195_p7)
}
  0x10   :  { %s226_s25 = smov 128   ;;  %s227_s26 = smov 8  }
  0x11   :  { %23 = dma.hbm_to_vmem [thread:$0]  %s311_s0, 256, %s18_s16, [#allocation3], %s226_s25, %s226_s25, %s227_s26  }
  0x12   :  { %s228_s29 = smov [#allocation4]   ;;  %s199_s7 = scalar_lea.hbm %s312_s1, 256 }
  0x13   :  { %s29_s30 = sshll.u32 %s228_s29, 4  ;;  %p200_p8 = scmp.ne.s32.totalorder %s312_s1, %s199_s7  ;;  %s30_s30 = int_to_ptr.vmem [resolvable:$true] %s29_s30 }
  0x14   :  { %p203_p9 = scmp.lt.u32.totalorder %s199_s7, %s312_s1 }
  0x16   :  { %p205_p10 = pnand %p203_p9, %p200_p8 }
  0x18   :  { %208 = shalt.err (!%p205_p10)
}
  0x19   :  { %s209_s12 = scalar_lea.vmem %s30_s30, 256  ;;  %p214_p12 = scmp.lt.s32.totalorder %s30_s30, %s30_s30 }
  0x1a   :  { %p210_p11 = scmp.ne.s32.totalorder %s30_s30, %s209_s12  ;;  %p215_p13 = scmp.lt.s32.totalorder %s209_s12, %s209_s12 }
  0x1c   :  { %p216_p0 = por %p215_p13, %p214_p12 }
  0x1e   :  { %p217_p1 = pnand %p216_p0, %p210_p11 }
  0x20   :  { %220 = shalt.err (!%p217_p1)
}
  0x21   :  { %s229_s0 = smov 64   ;;  %s230_s13 = smov 4  }
  0x22   :  { %35 = dma.hbm_to_vmem [thread:$0]  %s312_s1, 256, %s30_s30, [#allocation5], %s229_s0, %s229_s0, %s230_s13  }
  0x23   :  { %221 = dma.done.wait [#allocation3], 256  }
  0x24   :  { %222 = vsyncadd [#allocation3], 4294967040 }
  0x25   :  { %223 = dma.done.wait [#allocation5], 256  }
  0x26   :  { %224 = vsyncadd [#allocation5], 4294967040  ;;  %v231_v0 = vmov 0.0   ;;  %vm232_vm0 = vmmov 0   ;;  %v175_v1 = vld [vmem:[#allocation4] sm:$0xff]   ;;  %v176_v2 = vld [vmem:[#allocation4 + $0x8] sm:$0xff]  }
  0x27   :  { %158 = vmatprep.subr.bf16.mxu0 %v231_v0  ;;  %162 = vmatprep.mubr.msk.bf16.mxu0 %vm232_vm0, %v231_v0  ;;  %v43_v3 = vld [vmem:[#allocation2] sm:$0xff]  ;;  %v44_v4 = vld [vmem:[#allocation2 + $0x8] sm:$0xff]  ;;  %vm62_vm1 = vcmask 261120   ;;  %vm115_vm2 = vcmask 257024   ;;  %s233_s17 = smov 96  }
  0x28   :  { %159 = vmatpush3.bf16.msra.mxu0 %v175_v1  ;;  %v45_v5 = vpack.c.bf16 %v44_v4, %v43_v3 }
  0x29   :  { %160 = vmatprep.subr.bf16.mxu0 %v231_v0 }
  0x2c   :  { %161 = vmatpush3.bf16.msra.mxu0 %v176_v2 }
  0x2f   :  { %163 = vmatmul.mubr.msk.bf16.vlgmr.msra.gmra.mrb[0].mxu0 %vm62_vm1, %v45_v5 }
 0x102   :  { %v100_v6 = vpop.f32.mrb[0].mxu0 }
 0x103   :  { %v153_v7 = vpack.c.bf16 %v100_v6, %v100_v6  ;;  %v164_v8 = vpop.f32.mrb[1].mxu0 }
 0x104   :  { %v103_v9 = vpop.f32.mrb[2].mxu0 }
 0x105   :  { %116 = vst.msk [vmem:[%s313_s2] sm:$0xf] %vm115_vm2, %v153_v7  ;;  %v154_v10 = vpack.c.bf16 %v103_v9, %v103_v9  ;;  %126 = vrot.lane.b32.xlu1 %v153_v7, %s229_s0  ;;  %118 = vrot.lane.b32.xlu0 %v153_v7, %s233_s17  ;;  %v165_v11 = vpop.f32.mrb[3].mxu0 }
 0x107   :  { %117 = vst.msk [vmem:[%s313_s2 + $0x4] sm:$0xf] %vm115_vm2, %v154_v10 }
 0x109   :  { %128 = vrot.lane.b32.xlu1 %v154_v10, %s229_s0  ;;  %120 = vrot.lane.b32.xlu0 %v154_v10, %s233_s17 }
 0x177   :  { %v127_v12 = vpop.permute.xlu1 %126  ;;  %v119_v13 = vpop.permute.xlu0 %118 }
 0x178   :  { %132 = vst.msk [vmem:[%s315_s4] sm:$0xf] %vm115_vm2, %v127_v12  ;;  %124 = vst.msk [vmem:[%s314_s3] sm:$0xf] %vm115_vm2, %v119_v13 }
 0x17b   :  { %v129_v14 = vpop.permute.xlu1 %128  ;;  %v121_v15 = vpop.permute.xlu0 %120 }
 0x17c   :  { %133 = vst.msk [vmem:[%s315_s4 + $0x4] sm:$0xf] %vm115_vm2, %v129_v14  ;;  %125 = vst.msk [vmem:[%s314_s3 + $0x4] sm:$0xf] %vm115_vm2, %v121_v15 }
 0x17d   :  { %146 = vsyncpa [#allocation3], 1 }
 0x17e   :  { %147 = vsyncpa [#allocation5], 1 }

// kernel: self_attention_pallas.3
= control target key start
LH: loop header
LB: loop body
LE: loop exit
PB: predicated region body
PF: predicated region fallthrough
CT: control target
= control target key end

     0   :  { %8 = vsyncpa [#allocation6], 0  ;;  %s867_s0 = inlined_call_operand.vmem [shape: bf16[2,8,32], index: 0, kind: input, shape index: {}]   ;;  %s868_s1 = inlined_call_operand.vmem [shape: bf16[2,8,32], index: 1, kind: input, shape index: {}]   ;;  %s869_s2 = inlined_call_operand.vmem [shape: bf16[2,8,32], index: 2, kind: input, shape index: {}]   ;;  %s870_s3 = inlined_call_operand.hbm [shape: f32[2,8,32], index: 3, kind: output, shape index: {}]  }
   0x1   :  { %10 = vsyncpa [#allocation6 + $0x1], 0  ;;  %s732_s12 = smov 0   ;;  %s734_s13 = smov 0  }
   0x2   :  { %s736_s14 = smov 0   ;;  %s738_s15 = smov 0  }
   0x3   :  { %s740_s16 = smov 0   ;;  %s742_s17 = smov 0  }
   0x4 LB: > { %s529_s18 = sadd.s32 4294967295, %s705_s17   ;;  %s530_s19 = sadd.s32 4294967294, %s705_s17   ;;  %s705_s17 = sphi %s742_s17, %s16_s17   ;;  %s701_s16 = sphi %s740_s16, %s877_s16   ;;  %s697_s15 = sphi %s738_s15, %s876_s15   ;;  %s693_s14 = sphi %s736_s14, %s875_s14   ;;  %s689_s13 = sphi %s734_s13, %s874_s13   ;;  %s685_s12 = sphi %s732_s12, %s873_s12  }
   0x5   : > { %s35_s20 = sadd.s32 1, %s701_s16  ;;  %s128_s21 = sadd.s32 1, %s693_s14 }
   0x6   : > { %p37_p0 = scmp.ge.s32.totalorder %s35_s20, 2  ;;  %p138_p1 = scmp.ne.s32.totalorder %s693_s14, %s689_s13 }
   0x7   : > { %p139_p2 = scmp.eq.s32.totalorder %s529_s18, 1  ;;  %p144_p3 = scmp.ne.s32.totalorder %s689_s13, %s685_s12 }
   0x8   : > { %s879_s20 = smov (%p37_p0, %s35_s20), 0  ;;  %p145_p5 = scmp.eq.s32.totalorder %s530_s19, 1 }
   0x9   : > { %p772_p4 = por %p139_p2, %p138_p1  ;;  %s123_s23 = ssub.s32 %s701_s16, %s879_s20 }
   0xa   : > { %p533_p6 = scmp.ge.s32.totalorder %s705_s17, 1  ;;  %p126_p7 = scmp.eq.s32.totalorder %s123_s23, 0 }
   0xb   : > { %p779_p8 = por %p145_p5, %p144_p3  ;;  %p193_p9 = scmp.lt.s32.totalorder %s705_s17, 3 }
   0xc   : > { %s785_s25 = scalar_select %p126_p7, %s693_s14, %s128_s21  }
   0xd   : > { %p194_p10 = pnand %p533_p6, %p193_p9 }
   0xe   : > { %p233_p11 = scmp.lt.s32.totalorder (!%p194_p10), %s697_s15, 1  ;;  %vm262_vm0 = vcmask (!%p194_p10), 261120   ;;  %v707_v0 = vmov (!%p194_p10), 0.0   ;;  %vm708_vm1 = vmmov (!%p194_p10), 0   ;;  %vm259_vm2 = vcmask (!%p194_p10), 7168   ;;  %s230_s10 = sand.u32 (!%p194_p10), 1, %s689_s13  }
   0xf   : > { %197 = sbr.rel (%p194_p10) target bundleno = 843 (0x34b), region = 32  ;;  %548 = vmatprep.subr.bf16.mxu0 (!%p194_p10), %v707_v0  ;;  %263 = vst.msk [vmem:[#allocation4] sm:$0xff] (!%p194_p10), %vm262_vm0, %v707_v0  ;;  %550 = vmatprep.mubr.msk.bf16.mxu0 (!%p194_p10), %vm708_vm1, %v707_v0  ;;  %v709_v4 = vmov (!%p194_p10), -inf   ;;  %vm315_vm3 = vcmask (!%p194_p10), 64512   ;;  %v710_v10 = vmov (!%p194_p10), 0   ;;  %vm350_vm4 = vcmask (!%p194_p10), 1043456  }
  0x10   : > { %554 = vmatprep.subr.bf16.mxu1 (!%p194_p10), %v707_v0  ;;  %556 = vmatprep.mubr.msk.bf16.mxu1 (!%p194_p10), %vm708_vm1, %v707_v0  ;;  %260 = vst.msk [vmem:[#allocation2] sm:$0xff] (!%p194_p10), %vm259_vm2, %v709_v4  ;;  %261 = vst.msk [vmem:[#allocation3] sm:$0xff] (!%p194_p10), %vm259_vm2, %v707_v0  ;;  %s534_s11 = sshll.u32 (!%p194_p10), %s230_s10, 3  ;;  %s541_s18 = sshll.u32 (!%p194_p10), %s697_s15, 7 }
  0x11   : > { %619 = vset.pattern.permute.xlu0 (!%p194_p10), %v710_v10  ;;  %620 = vset.pattern.permute.xlu1 (!%p194_p10), %v710_v10  ;;  %s232_s19 = scalar_lea.vmem (!%p194_p10), [#allocation5], %s534_s11  ;;  %s411_s28 = scalar_lea.sflag (!%p194_p10), [#allocation6], %s230_s10 }
  0x12   : > { %s425_s21 = sshll.u32 (!%p194_p10), %s232_s19, 4  ;;  %s821_s21 = int_to_ptr.vmem [resolvable:$true] %s425_s21 }
  0x13   : > { %s627_s29 = scalar_lea.vmem (!%p194_p10), %s821_s21, 128 }
  0x14   : > { %p628_p12 = scmp.ne.s32.totalorder (!%p194_p10), %s821_s21, %s627_s29 }
  0x16   : > { %s234_s26 = scalar_select %p233_p11, %s697_s15, 1  ;;  %v339_v31 = vld [vmem:[#allocation4] sm:$0xff] }
  0x17   : > { %v314_v11 = vld [vmem:[#allocation2] sm:$0xff]  ;;  %v331_v25 = vld [vmem:[#allocation3] sm:$0xff]  ;;  %p629_p13 = pnand %p628_p12, %p772_p4  ;;  %s711_s15 = smov [#allocation5]  }
  0x18   : > { %s790_s27 = sshll.u32 %s234_s26, 2 }
  0x19   : > { %s246_s30 = scalar_lea.vmem %s868_s1, %s790_s27  ;;  %s239_s6 = scalar_lea.vmem %s867_s0, %s790_s27 }
  0x1a   : > { %v265_v1 = vld [vmem:[%s246_s30] sm:$0xf]  ;;  %s253_s9 = scalar_lea.vmem %s869_s2, %s790_s27  ;;  %s819_s27 = scalar_lea.hbm %s870_s3, %s541_s18 }
  0x1b   : > { %v272_v2 = vsel %vm262_vm0, %v265_v1, 0  ;;  %v264_v3 = vld [vmem:[%s239_s6] sm:$0xf]  ;;  %p630_p0 = pneg %p629_p13  ;;  %s631_s30 = sshll.u32 %s711_s15, 4  ;;  %s632_s30 = int_to_ptr.vmem [resolvable:$false] %s631_s30 }
  0x1c   : > { %549 = vmatpush3.bf16.xpose.msra.mxu0 %v272_v2  ;;  %v266_v15 = vld [vmem:[%s253_s9] sm:$0xf]  ;;  %s633_s4 = scalar_lea.vmem %s632_s30, 256  ;;  %p634_p1 = scmp.lt.s32.totalorder %s821_s21, %s632_s30 }
  0x1d   : > { %v352_v16 = vsel %vm350_vm4, %v266_v15, 0  ;;  %p635_p2 = scmp.lt.s32.totalorder %s633_s4, %s627_s29 }
  0x1e   : > { %555 = vmatpush3.bf16.msra.mxu1 %v352_v16 }
  0x1f   : > { %p636_p3 = por %p635_p2, %p634_p1 }
  0x21   : > { %p637_p5 = pnand %p636_p3, %p630_p0 }
  0x23   : > { %551 = vmatmul.mubr.msk.bf16.vlgmr.msra.gmra.mrb[0].mxu0 %vm262_vm0, %v264_v3 }
  0xf6   : > { %v308_v5 = vpop.f32.mrb[0].mxu0 }
  0xf7   : > { %v552_v6 = vpop.f32.mrb[1].mxu0  ;;  %v316_v7 = vsel %vm315_vm3, %v308_v5, -inf }
  0xf8   : > { %317 = vmax.xlane.f32.xlu0 %v316_v7  ;;  %v311_v8 = vpop.f32.mrb[2].mxu0 }
  0xf9   : > { %v553_v9 = vpop.f32.mrb[3].mxu0 }
 0x185   : > { %v318_v12 = vpop.xlane.xlu0 %317 }
 0x186   : > { %v319_v13 = vmax.f32 %v314_v11, %v318_v12 }
 0x188   : > { %v320_v14 = vsub.f32 %v314_v11, %v319_v13  ;;  %396 = vst.msk [vmem:[#allocation2] sm:$0xff] %vm259_vm2, %v319_v13  ;;  %325 = vperm.xlu0 %619, %v319_v13  }
 0x18a   : > { %v321_v23 = vmul.f32 1.442695, %v320_v14 }
 0x207   : > { %v326_v17 = vpop.permute.xlu0 %325 }
 0x208   : > { %v328_v18 = vsub.f32 %v308_v5, %v326_v17 }
 0x20a   : > { %v329_v19 = vmul.f32 1.442695, %v328_v18 }
 0x20c   : > { %621 = vpow2.f32 %v329_v19 }
 0x20d   : > { %623 = vpow2.f32 %v321_v23 }
 0x216   : > { %v622_v20 = vpop.eup %621 }
 0x217   : > { %v333_v21 = vsel %vm315_vm3, %v622_v20, 0.0  ;;  %v346_v22 = vpack.c.bf16 %v622_v20, %v622_v20  ;;  %v624_v24 = vpop.eup %623 }
 0x218   : > { %334 = vadd.xlane.f32.xlu1 %v333_v21  ;;  %v332_v26 = vmul.f32 %v624_v24, %v331_v25 }
 0x219   : > { %557 = vmatmul.mubr.msk.bf16.vlgmr.msra.gmra.mrb[0].mxu1 %vm315_vm3, %v346_v22 }
 0x229   : > { %342 = vperm.xlu1 %620, %v624_v24  }
 0x2a5   : > { %v335_v27 = vpop.xlane.xlu1 %334 }
 0x2a6   : > { %v336_v28 = vadd.f32 %v335_v27, %v332_v26 }
 0x2a8   : > { %338 = vst.msk [vmem:[#allocation3] sm:$0xff] %vm259_vm2, %v336_v28 }
 0x2a9   : > { %v343_v32 = vpop.permute.xlu1 %342 }
 0x2aa   : > { %v345_v33 = vmul.f32 %v343_v32, %v339_v31 }
 0x2af   : > { %v400_v29 = vld [vmem:[#allocation3] sm:$0xff] }
 0x2b0   : > { %625 = vrcp.f32 %v400_v29 }
 0x2ba   : > { %v626_v30 = vpop.eup %625 }
 0x2bb   : > { %405 = vperm.xlu1 %620, %v626_v30  }
 0x2ec   : > { %v388_v34 = vpop.f32.mrb[0].mxu1 }
 0x2ed   : > { %v394_v35 = vadd.f32 %v388_v34, %v345_v33  ;;  %v558_v36 = vpop.f32.mrb[1].mxu1 }
 0x2ee   : > { %v391_v37 = vpop.f32.mrb[2].mxu1 }
 0x2ef   : > { %395 = vst.msk [vmem:[#allocation4] sm:$0xff] %vm262_vm0, %v394_v35  ;;  %v559_v38 = vpop.f32.mrb[3].mxu1 }
 0x2f6   : > { %v402_v39 = vld [vmem:[#allocation4] sm:$0xff] }
 0x33a   : > { %v406_v40 = vpop.permute.xlu1 %405 }
 0x33b   : > { %v408_v41 = vmul.f32 %v406_v40, %v402_v39 }
 0x33d   : > { %409 = vst.msk [vmem:[%s232_s19] sm:$0xff] %vm262_vm0, %v408_v41 }
 0x33e   : > { %640 = shalt.err (!%p637_p5)
}
 0x33f   : > { %s641_s5 = scalar_lea.hbm %s819_s27, 128  ;;  %s645_s8 = scalar_lea.hbm %s870_s3, 256 }
 0x340   : > { %p642_p6 = scmp.ne.s32.totalorder %s819_s27, %s641_s5  ;;  %p646_p10 = scmp.lt.u32.totalorder %s819_s27, %s870_s3 }
 0x341   : > { %p647_p11 = scmp.lt.u32.totalorder %s645_s8, %s641_s5  ;;  %p649_p13 = scmp.lt.u32.totalorder %s641_s5, %s819_s27 }
 0x342   : > { %p643_p7 = pnand %p642_p6, %p772_p4 }
 0x343   : > { %p648_p12 = por %p647_p11, %p646_p10 }
 0x344   : > { %p644_p9 = pneg %p643_p7 }
 0x345   : > { %p650_p0 = por %p649_p13, %p648_p12 }
 0x347   : > { %p651_p1 = pnand %p650_p0, %p644_p9 }
 0x349   : > { %654 = shalt.err (!%p651_p1)
}
 0x34a   : > { %560 = dma.vmem_to_hbm [thread:$0]  (%p772_p4), %s821_s21, 128, %s819_s27, %s411_s28  }
 0x34b PF: > { %p566_p2 = scmp.ge.s32.totalorder %s705_s17, 2  ;;  %s437_s11 = sand.u32 1, %s685_s12  }
 0x34c   : > { %s438_s18 = scalar_lea.sflag [#allocation6], %s437_s11 }
 0x34d   : > { %p563_p3 = pnand %p566_p2, %p779_p8 }
 0x34f   : > { %680 = dma.done.wait (!%p563_p3), %s438_s18, 128  }
 0x350   : > { %682 = vsyncadd (!%p563_p3), %s438_s18, 4294967168  ;;  %s16_s17 = sadd.s32 1, %s705_s17   ;;  %s873_s12 = smov %s689_s13 }
 0x351   : > { %p13_p5 = scmp.ge.s32.totalorder %s16_s17, 4   ;;  %s874_s13 = smov %s693_s14 }
 0x352   : > { %s875_s14 = smov %s785_s25  ;;  %s876_s15 = smov %s701_s16 }
 0x353   : > { %s877_s16 = smov %s879_s20  ;;  %15 = sbr.rel (!%p13_p5) target bundleno = 4 (0x4), region = 81 }
 0x35a   :  { %443 = vsyncpa [#allocation6], 1 }
 0x35b   :  { %445 = vsyncpa [#allocation6 + $0x1], 1 }

</bundles_post_ra>
